<compile_context>
chip_gen: v7x
topology: tpu7x:2x2x1
jax: 0.10.0
libtpu: 0.0.40
codegen_flags: <defaults>
</compile_context>

<pallas_src>
import numpy as np
import jax
import jax.numpy as jnp
from jax.experimental import pallas as pl
from jax.experimental.pallas import tpu as pltpu


# ----------------------------------------------------------------------------
# Pallas kernel factory: lane-dense elementwise LSE solve + blend + F_bt
# ----------------------------------------------------------------------------
def _make_lse_accel_kernel(t):
    # cof = (A'A)^(-1) A'  (matches LSE_acceleration_solver.__init__)
    A_np = np.array([-1, 0.5, 1, 0.5, 2, 2], dtype=np.float64).reshape(3, 2)
    cof = np.linalg.inv(A_np.T @ A_np) @ A_np.T            # (2, 3)
    t_f = float(t)
    half_t2 = 0.5 * t_f * t_f

    # LS branch folded:  p = v0*t + 0.5*t^2*acc = k0*f1 + k1*f2 + k2*f3
    k0 = float(cof[0, 0] * t_f + cof[1, 0] * half_t2)
    k1 = float(cof[0, 1] * t_f + cof[1, 1] * half_t2)
    k2 = float(cof[0, 2] * t_f + cof[1, 2] * half_t2)
    # Fallback branch folded: q = v0_1*t + 0.5*t^2*acc_1,
    #   v0_1 = 0.5*(f2 - f1), acc_1 = f1 + f2
    q0 = float(-0.5 * t_f + half_t2)
    q1 = float(0.5 * t_f + half_t2)

    def kernel(fba_ref, fbc_ref, fbd_ref, out_ref):
        f1 = fba_ref[...]   # F_ba tile
        f2 = fbc_ref[...]   # F_bc tile
        f3 = fbd_ref[...]   # F_bd tile

        # F_bt contribution of the least-squares solution (t folded in)
        p = k0 * f1 + k1 * f2 + k2 * f3
        # F_bt contribution of the fallback (v0_1, acc_1) solution
        q = q0 * f1 + q1 * f2

        acc_1 = f1 + f2
        acc_2 = (2.0 / 3.0) * f1 + (1.0 / 3.0) * f3
        acc_3 = f3 - 2.0 * f2

        # alpha = -0.5*tanh(|x| - 5) + 0.5  (stable single-EUP form of the
        # exp-based expression in the PyTorch reference)
        alpha = 0.5 * (1.0 - jnp.tanh(jnp.abs(acc_1 - acc_2) - 5.0))

        cond = (acc_1 * acc_2 > 0.0) & (acc_1 * acc_3 > 0.0)
        out_ref[...] = jnp.where(cond, q + alpha * (p - q), q)

    return kernel


def lse_acceleration_pallas(F_ba, F_bc, F_bd, t, *, fallback_lane=512,
                            max_block_bytes=2 << 20):
    """F_ba/F_bc/F_bd: [B, 2, H, W] float32 flows; t: python float. -> F_bt [B, 2, H, W]."""
    orig_shape = F_ba.shape
    n = int(np.prod(orig_shape))
    W = int(orig_shape[-1])

    # ---- choose a zero-copy, lane-dense slab -------------------------------
    pad_tail = 0
    if W % 128 == 0:
        # Natural layout: (B*2*H, W) — free reshape, no padding, no out-slice.
        lane = W
        rows = n // W
    elif n % fallback_lane == 0:
        lane = fallback_lane
        rows = n // lane
    else:
        # Truly ragged: pad only up to one lane multiple (tail discarded).
        lane = fallback_lane
        rows = -(-n // lane)
        pad_tail = rows * lane - n

    def to_slab(x):
        x = x.astype(jnp.float32).reshape(-1)
        if pad_tail:
            x = jnp.pad(x, (0, pad_tail))
        return x.reshape(rows, lane)

    fba, fbc, fbd = to_slab(F_ba), to_slab(F_bc), to_slab(F_bd)

    # ---- tile rows: ~max_block_bytes per array block, >=2 grid steps -------
    if rows <= 8:
        tile_rows = rows
    else:
        cap = max(8, (max_block_bytes // (lane * 4) // 8) * 8)
        tile_rows = min(cap, (rows // 8) * 8)
        if tile_rows >= rows:
            # Split so v7x's two TensorCores both get work.
            tile_rows = max(8, ((rows // 2) // 8) * 8)
    grid = pl.cdiv(rows, tile_rows)   # ragged last block is masked by Pallas

    tile_spec = pl.BlockSpec((tile_rows, lane), lambda i: (i, 0))
    kernel = _make_lse_accel_kernel(t)

    cost = pl.CostEstimate(
        flops=25 * n,                 # ~25 VALU ops / element
        transcendentals=n,            # one tanh / element
        bytes_accessed=4 * n * 4,     # 3 reads + 1 write, f32
    )

    out = pl.pallas_call(
        kernel,
        out_shape=jax.ShapeDtypeStruct((rows, lane), jnp.float32),
        grid=(grid,),
        in_specs=[tile_spec, tile_spec, tile_spec],
        out_specs=tile_spec,
        compiler_params=pltpu.CompilerParams(
            dimension_semantics=("parallel",),
            vmem_limit_bytes=32 << 20),
        cost_estimate=cost,
    )(fba, fbc, fbd)

    if pad_tail:
        out = out.reshape(-1)[:n]
    return out.reshape(orig_shape)


# ----------------------------------------------------------------------------
# Synthetic deterministic "flownet" (external submodule -> plain-JAX glue)
# ----------------------------------------------------------------------------
# TODO(synk): the real flownet architecture is not defined in the reference
# module; a fixed 1x1-conv stand-in producing a [B, 2, H, W] flow is used.
# Its output is already in the contiguous [B,2,H,W] layout the kernel's slab
# reshape consumes, so XLA inserts no relayout copy; fusing the flow head
# into the Pallas kernel would remove the remaining HBM round-trip but
# depends on the external model's structure.
def make_flownet(c_img):
    key = jax.random.PRNGKey(0)
    w = 0.1 * jax.random.normal(key, (2, 2 * c_img), dtype=jnp.float32)

    def flownet(I1, I2):
        x = jnp.concatenate([I1, I2], axis=1)                 # [B, 2C, H, W]
        return jnp.einsum("oc,bchw->bohw", w, x)              # [B, 2, H, W]

    return flownet


def compute_acceleration_forward(flownet, Ia, Ib, Ic, Id, t):
    F_ba = flownet(Ib, Ia).astype(jnp.float32)
    F_bc = flownet(Ib, Ic).astype(jnp.float32)
    F_bd = flownet(Ib, Id).astype(jnp.float32)
    return lse_acceleration_pallas(F_ba, F_bc, F_bd, t)


# ----------------------------------------------------------------------------
# Pure-JAX reference (mirrors the PyTorch math) for a correctness check
# ----------------------------------------------------------------------------
def _reference(F_ba, F_bc, F_bd, t):
    A_np = np.array([-1, 0.5, 1, 0.5, 2, 2], dtype=np.float64).reshape(3, 2)
    cof = jnp.asarray(np.linalg.inv(A_np.T @ A_np) @ A_np.T, dtype=jnp.float32)
    B, C, H, W = F_ba.shape

    def solve(f1, f2, f3):  # each [B, H, W]
        b = jnp.stack([f1.reshape(B, -1), f2.reshape(B, -1),
                       f3.reshape(B, -1)], axis=1)            # [B, 3, HW]
        res = jnp.einsum("ij,bjk->bik", cof, b).reshape(B, 2, H, W)
        return res[:, 0], res[:, 1]                           # v0, acc

    v0_u, acc_u = solve(F_ba[:, 0], F_bc[:, 0], F_bd[:, 0])
    v0_v, acc_v = solve(F_ba[:, 1], F_bc[:, 1], F_bd[:, 1])
    acc = jnp.stack([acc_u, acc_v], axis=1)
    v0 = jnp.stack([v0_u, v0_v], axis=1)

    acc_1 = F_ba + F_bc
    acc_2 = 2 / 3 * F_ba + 1 / 3 * F_bd
    acc_3 = F_bd - 2 * F_bc
    v0_1 = 0.5 * (F_bc - F_ba)
    x = acc_1 - acc_2
    y = jnp.abs(x) - 5.0
    alpha = -0.5 * (jnp.exp(y) - jnp.exp(-y)) / (jnp.exp(y) + jnp.exp(-y)) + 0.5
    cond = (acc_1 * acc_2 > 0) & (acc_1 * acc_3 > 0)
    acc_final = jnp.where(cond, alpha * acc + (1 - alpha) * acc_1, acc_1)
    v0_final = jnp.where(cond, alpha * v0 + (1 - alpha) * v0_1, v0_1)
    return v0_final * t + 0.5 * acc_final * t ** 2


if __name__ == "__main__":
    C_img = 3
    t = 0.5
    flownet = make_flownet(C_img)

    # Exercise all three slab paths:
    #   (16,16)  -> n % 512 == 0 flatten path, single grid step
    #   (24,128) -> natural-layout (lane = W) path, 2 grid steps
    #   (24,40)  -> ragged fallback path (single lane-multiple pad + slice)
    for (B, H, W) in [(2, 16, 16), (2, 24, 128), (2, 24, 40)]:
        key = jax.random.PRNGKey(0)
        ka, kb, kc, kd = jax.random.split(key, 4)
        Ia = jax.random.normal(ka, (B, C_img, H, W), dtype=jnp.float32)
        Ib = jax.random.normal(kb, (B, C_img, H, W), dtype=jnp.float32)
        Ic = jax.random.normal(kc, (B, C_img, H, W), dtype=jnp.float32)
        Id = jax.random.normal(kd, (B, C_img, H, W), dtype=jnp.float32)

        F_bt = compute_acceleration_forward(flownet, Ia, Ib, Ic, Id, t)
        F_bt = jax.block_until_ready(F_bt)

        # correctness check against pure-JAX reference
        F_ba = flownet(Ib, Ia)
        F_bc = flownet(Ib, Ic)
        F_bd = flownet(Ib, Id)
        ref = jax.block_until_ready(_reference(F_ba, F_bc, F_bd, t))
        np.testing.assert_allclose(np.asarray(F_bt), np.asarray(ref),
                                   rtol=1e-5, atol=1e-5)

    print("KERNEL_OK")
</pallas_src>

<mosaic_0001>
module attributes {stable_mosaic.version = 11 : i64} {
  func.func @kernel(%arg0: i32, %arg1: memref<2x512xf32, #tpu.memory_space<vmem>>, %arg2: memref<2x512xf32, #tpu.memory_space<vmem>>, %arg3: memref<2x512xf32, #tpu.memory_space<vmem>>, %arg4: memref<2x512xf32, #tpu.memory_space<vmem>>) attributes {dimension_semantics = [#tpu.dimension_semantics<parallel>], iteration_bounds = array<i64: 1>, scalar_prefetch = 0 : i64, scratch_operands = 0 : i64, tpu.core_type = #tpu.core_type<tc>, window_params = [{transform_indices = @transform_0, window_bounds = array<i64: 2, 512>}, {transform_indices = @transform_1, window_bounds = array<i64: 2, 512>}, {transform_indices = @transform_2, window_bounds = array<i64: 2, 512>}, {transform_indices = @transform_3, window_bounds = array<i64: 2, 512>}]} {
    %c0 = arith.constant 0 : index
    %c0_0 = arith.constant 0 : index
    %0 = vector.load %arg1[%c0, %c0_0] : memref<2x512xf32, #tpu.memory_space<vmem>>, vector<2x512xf32>
    %c0_1 = arith.constant 0 : index
    %c0_2 = arith.constant 0 : index
    %1 = vector.load %arg2[%c0_1, %c0_2] : memref<2x512xf32, #tpu.memory_space<vmem>>, vector<2x512xf32>
    %c0_3 = arith.constant 0 : index
    %c0_4 = arith.constant 0 : index
    %2 = vector.load %arg3[%c0_3, %c0_4] : memref<2x512xf32, #tpu.memory_space<vmem>>, vector<2x512xf32>
    %cst = arith.constant -0.215909094 : f32
    %3 = vector.broadcast %cst : f32 to vector<2x512xf32>
    %4 = arith.mulf %3, %0 : vector<2x512xf32>
    %cst_5 = arith.constant 0.102272727 : f32
    %5 = vector.broadcast %cst_5 : f32 to vector<2x512xf32>
    %6 = arith.mulf %5, %1 : vector<2x512xf32>
    %7 = arith.addf %4, %6 : vector<2x512xf32>
    %cst_6 = arith.constant 0.0909090936 : f32
    %8 = vector.broadcast %cst_6 : f32 to vector<2x512xf32>
    %9 = arith.mulf %8, %2 : vector<2x512xf32>
    %10 = arith.addf %7, %9 : vector<2x512xf32>
    %cst_7 = arith.constant -1.250000e-01 : f32
    %11 = vector.broadcast %cst_7 : f32 to vector<2x512xf32>
    %12 = arith.mulf %11, %0 : vector<2x512xf32>
    %cst_8 = arith.constant 3.750000e-01 : f32
    %13 = vector.broadcast %cst_8 : f32 to vector<2x512xf32>
    %14 = arith.mulf %13, %1 : vector<2x512xf32>
    %15 = arith.addf %12, %14 : vector<2x512xf32>
    %16 = arith.addf %0, %1 : vector<2x512xf32>
    %cst_9 = arith.constant 0.666666686 : f32
    %17 = vector.broadcast %cst_9 : f32 to vector<2x512xf32>
    %18 = arith.mulf %17, %0 : vector<2x512xf32>
    %cst_10 = arith.constant 0.333333343 : f32
    %19 = vector.broadcast %cst_10 : f32 to vector<2x512xf32>
    %20 = arith.mulf %19, %2 : vector<2x512xf32>
    %21 = arith.addf %18, %20 : vector<2x512xf32>
    %cst_11 = arith.constant 2.000000e+00 : f32
    %22 = vector.broadcast %cst_11 : f32 to vector<2x512xf32>
    %23 = arith.mulf %22, %1 : vector<2x512xf32>
    %24 = arith.subf %2, %23 : vector<2x512xf32>
    %25 = arith.subf %16, %21 : vector<2x512xf32>
    %26 = math.absf %25 : vector<2x512xf32>
    %cst_12 = arith.constant 5.000000e+00 : f32
    %27 = vector.broadcast %cst_12 : f32 to vector<2x512xf32>
    %28 = arith.subf %26, %27 : vector<2x512xf32>
    %29 = math.tanh %28 : vector<2x512xf32>
    %cst_13 = arith.constant 1.000000e+00 : f32
    %30 = vector.broadcast %cst_13 : f32 to vector<2x512xf32>
    %31 = arith.subf %30, %29 : vector<2x512xf32>
    %cst_14 = arith.constant 5.000000e-01 : f32
    %32 = vector.broadcast %cst_14 : f32 to vector<2x512xf32>
    %33 = arith.mulf %32, %31 : vector<2x512xf32>
    %34 = arith.mulf %16, %21 : vector<2x512xf32>
    %cst_15 = arith.constant 0.000000e+00 : f32
    %35 = vector.broadcast %cst_15 : f32 to vector<2x512xf32>
    %36 = arith.cmpf ogt, %34, %35 : vector<2x512xf32>
    %37 = arith.mulf %16, %24 : vector<2x512xf32>
    %cst_16 = arith.constant 0.000000e+00 : f32
    %38 = vector.broadcast %cst_16 : f32 to vector<2x512xf32>
    %39 = arith.cmpf ogt, %37, %38 : vector<2x512xf32>
    %40 = arith.andi %36, %39 : vector<2x512xi1>
    %41 = arith.subf %10, %15 : vector<2x512xf32>
    %42 = arith.mulf %33, %41 : vector<2x512xf32>
    %43 = arith.addf %15, %42 : vector<2x512xf32>
    %44 = arith.select %40, %43, %15 : vector<2x512xi1>, vector<2x512xf32>
    %c0_17 = arith.constant 0 : index
    %c0_18 = arith.constant 0 : index
    %45 = vector.load %arg4[%c0_17, %c0_18] : memref<2x512xf32, #tpu.memory_space<vmem>>, vector<2x512xf32>
    tpu.vector_store %arg4[%c0_17, %c0_18], %44 {strides = array<i32>} : memref<2x512xf32, #tpu.memory_space<vmem>>, vector<2x512xf32>,
    return
  }
  func.func @transform_0(%arg0: i32) -> (i32, i32) {
    %c0_i32 = arith.constant 0 : i32
    %c0_i32_0 = arith.constant 0 : i32
    return %arg0, %c0_i32 : i32, i32
  }
  func.func @transform_1(%arg0: i32) -> (i32, i32) {
    %c0_i32 = arith.constant 0 : i32
    %c0_i32_0 = arith.constant 0 : i32
    return %arg0, %c0_i32 : i32, i32
  }
  func.func @transform_2(%arg0: i32) -> (i32, i32) {
    %c0_i32 = arith.constant 0 : i32
    %c0_i32_0 = arith.constant 0 : i32
    return %arg0, %c0_i32 : i32, i32
  }
  func.func @transform_3(%arg0: i32) -> (i32, i32) {
    %c0_i32 = arith.constant 0 : i32
    %c0_i32_0 = arith.constant 0 : i32
    return %arg0, %c0_i32 : i32, i32
  }
}

</mosaic_0001>

<bundles_post_ra>
// kernel: tpu_custom_call.1
= control target key start
LH: loop header
LB: loop body
LE: loop exit
PB: predicated region body
PF: predicated region fallthrough
CT: control target
= control target key end

     0   :  { %8 = vsyncpa [#allocation3], 0  ;;  %s272_s0 = inlined_call_operand.hbm [shape: f32[2,512], index: 0, kind: input, shape index: {}]   ;;  %s273_s1 = inlined_call_operand.hbm [shape: f32[2,512], index: 1, kind: input, shape index: {}]   ;;  %s274_s2 = inlined_call_operand.hbm [shape: f32[2,512], index: 2, kind: input, shape index: {}]   ;;  %s275_s3 = inlined_call_operand.hbm [shape: f32[2,512], index: 3, kind: output, shape index: {}]  }
   0x1   :  { %9 = vsyncpa [#allocation6], 0 }
   0x2   :  { %10 = vsyncpa [#allocation4], 0  ;;  %s200_s12 = smov [#allocation5]   ;;  %s201_s14 = smov [#allocation2]  }
   0x3   :  { %s27_s13 = sshll.u32 %s200_s12, 4  ;;  %s17_s15 = sshll.u32 %s201_s14, 4  ;;  %s28_s13 = int_to_ptr.vmem [resolvable:$true] %s27_s13  ;;  %s18_s15 = int_to_ptr.vmem [resolvable:$true] %s17_s15 }
   0x4   :  { %s106_s18 = scalar_lea.hbm %s273_s1, 128 }
   0x5   :  { %p107_p0 = scmp.ne.s32.totalorder %s273_s1, %s106_s18  ;;  %p110_p1 = scmp.lt.u32.totalorder %s106_s18, %s273_s1 }
   0x7   :  { %p112_p2 = pnand %p110_p1, %p107_p0 }
   0x9   :  { %115 = shalt.err (!%p112_p2)
}
   0xa   :  { %s116_s23 = scalar_lea.vmem %s28_s13, 128  ;;  %p121_p4 = scmp.lt.s32.totalorder %s28_s13, %s28_s13 }
   0xb   :  { %p117_p3 = scmp.ne.s32.totalorder %s28_s13, %s116_s23  ;;  %p122_p5 = scmp.lt.s32.totalorder %s116_s23, %s116_s23 }
   0xd   :  { %p123_p6 = por %p122_p5, %p121_p4 }
   0xf   :  { %p124_p7 = pnand %p123_p6, %p117_p3 }
  0x11   :  { %127 = shalt.err (!%p124_p7)
}
  0x12   :  { %30 = dma.hbm_to_vmem [thread:$0]  %s273_s1, 128, %s28_s13, [#allocation6]  }
  0x13   :  { %s128_s28 = scalar_lea.hbm %s272_s0, 128 }
  0x14   :  { %p129_p8 = scmp.ne.s32.totalorder %s272_s0, %s128_s28  ;;  %p132_p9 = scmp.lt.u32.totalorder %s128_s28, %s272_s0 }
  0x16   :  { %p134_p10 = pnand %p132_p9, %p129_p8 }
  0x18   :  { %137 = shalt.err (!%p134_p10)
}
  0x19   :  { %s138_s6 = scalar_lea.vmem %s18_s15, 128  ;;  %p143_p12 = scmp.lt.s32.totalorder %s18_s15, %s18_s15 }
  0x1a   :  { %p139_p11 = scmp.ne.s32.totalorder %s18_s15, %s138_s6  ;;  %p144_p13 = scmp.lt.s32.totalorder %s138_s6, %s138_s6 }
  0x1c   :  { %p145_p0 = por %p144_p13, %p143_p12 }
  0x1e   :  { %p146_p1 = pnand %p145_p0, %p139_p11 }
  0x20   :  { %149 = shalt.err (!%p146_p1)
}
  0x21   :  { %20 = dma.hbm_to_vmem [thread:$0]  %s272_s0, 128, %s18_s15, [#allocation3]  }
  0x22   :  { %s202_s8 = smov [#allocation7]   ;;  %s150_s12 = scalar_lea.hbm %s274_s2, 128 }
  0x23   :  { %s37_s9 = sshll.u32 %s202_s8, 4  ;;  %p151_p2 = scmp.ne.s32.totalorder %s274_s2, %s150_s12  ;;  %s38_s9 = int_to_ptr.vmem [resolvable:$true] %s37_s9 }
  0x24   :  { %p154_p3 = scmp.lt.u32.totalorder %s150_s12, %s274_s2 }
  0x26   :  { %p156_p4 = pnand %p154_p3, %p151_p2 }
  0x28   :  { %159 = shalt.err (!%p156_p4)
}
  0x29   :  { %s160_s18 = scalar_lea.vmem %s38_s9, 128  ;;  %p165_p6 = scmp.lt.s32.totalorder %s38_s9, %s38_s9 }
  0x2a   :  { %p161_p5 = scmp.ne.s32.totalorder %s38_s9, %s160_s18  ;;  %p166_p7 = scmp.lt.s32.totalorder %s160_s18, %s160_s18 }
  0x2c   :  { %p167_p8 = por %p166_p7, %p165_p6 }
  0x2e   :  { %p168_p9 = pnand %p167_p8, %p161_p5 }
  0x30   :  { %171 = shalt.err (!%p168_p9)
}
  0x31   :  { %40 = dma.hbm_to_vmem [thread:$0]  %s274_s2, 128, %s38_s9, [#allocation6]  }
  0x32   :  { %194 = dma.done.wait [#allocation3], 128  }
  0x33   :  { %195 = vsyncadd [#allocation3], 4294967168 }
  0x34   :  { %196 = dma.done.wait [#allocation6], 256  }
  0x35   :  { %197 = vsyncadd [#allocation6], 4294967040  ;;  %v50_v0 = vld [vmem:[#allocation2] sm:$0xff]  ;;  %v51_v1 = vld [vmem:[#allocation5] sm:$0xff]  ;;  %s203_s2 = smov [#allocation8]  }
  0x36   :  { %v52_v2 = vld [vmem:[#allocation7] sm:$0xff]  ;;  %v61_v3 = vadd.f32 %v51_v1, %v50_v0  ;;  %v62_v4 = vmul.f32 0.6666667, %v50_v0  ;;  %v53_v10 = vmul.f32 -0.2159091, %v50_v0  ;;  %v65_v12 = vmul.f32 2.0, %v51_v1 }
  0x37   :  { %v63_v5 = vmul.f32 0.33333334, %v52_v2  ;;  %v54_v11 = vmul.f32 0.10227273, %v51_v1  ;;  %v56_v14 = vmul.f32 0.09090909, %v52_v2 }
  0x38   :  { %v58_v15 = vmul.f32 -0.125, %v50_v0  ;;  %v59_v16 = vmul.f32 0.375, %v51_v1  ;;  %v66_v17 = vsub.f32 %v52_v2, %v65_v12  ;;  %s89_s19 = sshll.u32 %s203_s2, 4  ;;  %s90_s19 = int_to_ptr.vmem [resolvable:$true] %s89_s19 }
  0x39   :  { %v64_v6 = vadd.f32 %v63_v5, %v62_v4  ;;  %v55_v13 = vadd.f32 %v54_v11, %v53_v10  ;;  %s172_s20 = scalar_lea.vmem %s90_s19, 128  ;;  %p177_p11 = scmp.lt.s32.totalorder %s90_s19, %s90_s19 }
  0x3a   :  { %v60_v19 = vadd.f32 %v59_v16, %v58_v15  ;;  %v75_v21 = vmul.f32 %v66_v17, %v61_v3  ;;  %p173_p10 = scmp.ne.s32.totalorder %s90_s19, %s172_s20  ;;  %p178_p12 = scmp.lt.s32.totalorder %s172_s20, %s172_s20 }
  0x3b   :  { %v67_v7 = vsub.f32 %v61_v3, %v64_v6  ;;  %v57_v18 = vadd.f32 %v56_v14, %v55_v13  ;;  %v73_v20 = vmul.f32 %v64_v6, %v61_v3 }
  0x3c   :  { %vm76_vm1 = vcmp.gt.f32.partialorder %v75_v21, 0.0  ;;  %p179_p13 = por %p178_p12, %p177_p11 }
  0x3d   :  { %v68_v8 = vand.u32 2147483647, %v67_v7  ;;  %v78_v24 = vsub.f32 %v57_v18, %v60_v19  ;;  %vm74_vm0 = vcmp.gt.f32.partialorder %v73_v20, 0.0 }
  0x3e   :  { %vm77_vm2 = vmand %vm74_vm0, %vm76_vm1  ;;  %p180_p0 = pnand %p179_p13, %p173_p10 }
  0x3f   :  { %v99_v9 = vadd.f32 -5.0, %v68_v8 }
  0x41   :  { %104 = vtanh.f32 %v99_v9 }
  0x4b   :  { %v105_v22 = vpop.eup %104 }
  0x4c   :  { %v71_v23 = vsub.f32 1.0, %v105_v22 }
  0x4e   :  { %v72_v25 = vmul.f32 0.5, %v71_v23 }
  0x50   :  { %v79_v26 = vmul.f32 %v78_v24, %v72_v25 }
  0x52   :  { %v80_v27 = vadd.f32 %v79_v26, %v60_v19 }
  0x54   :  { %v81_v28 = vsel %vm77_vm2, %v80_v27, %v60_v19 }
  0x55   :  { %82 = vst [vmem:[#allocation8] sm:$0xff] %v81_v28 }
  0x56   :  { %183 = shalt.err (!%p180_p0)
}
  0x57   :  { %s184_s23 = scalar_lea.hbm %s275_s3, 128 }
  0x58   :  { %p185_p1 = scmp.ne.s32.totalorder %s275_s3, %s184_s23  ;;  %p188_p2 = scmp.lt.u32.totalorder %s184_s23, %s275_s3 }
  0x5a   :  { %p190_p3 = pnand %p188_p2, %p185_p1 }
  0x5c   :  { %193 = shalt.err (!%p190_p3)
}
  0x5d   :  { %92 = dma.vmem_to_hbm [thread:$0]  %s90_s19, 128, %s275_s3, [#allocation4]  }
  0x5e   :  { %198 = dma.done.wait [#allocation4], 128  }
  0x5f   :  { %199 = vsyncadd [#allocation4], 4294967168 }
  0x60   :  { %96 = vsyncpa [#allocation3], 1 }
  0x61   :  { %97 = vsyncpa [#allocation6], 1 }
  0x62   :  { %98 = vsyncpa [#allocation4], 1 }

</bundles_post_ra>
